<compile_context>
chip_gen: v7x
topology: tpu7x:2x2x1
jax: 0.10.0
libtpu: 0.0.40
codegen_flags: <defaults>
</compile_context>

<pallas_src>
import functools

import jax
import jax.numpy as jnp
from jax.experimental import pallas as pl
from jax.experimental.pallas import tpu as pltpu


def _postprocess_kernel(num_select, logits_ref, bbox_ref, rowmax_ref,
                        scale_ref, scores_ref, labels_ref, boxes_ref,
                        work_ref, bsel_ref):
    # Block shapes:
    #   logits_ref (1, Q, C)   bbox_ref (1, Q, 4)   rowmax_ref (1, 1, Q)
    #   scale_ref  (1, 1, 4)
    #   scores_ref (1, 1, NS)  labels_ref (1, 1, NS)  boxes_ref (1, NS, 4)
    #   work_ref   (Q, C)  f32 scratch (mutable working copy of the logits)
    #   bsel_ref   (NS, 4) f32 scratch (selected boxes, cxcywh)
    _, Q, C = logits_ref.shape
    NS = num_select
    NEG = jnp.float32(-1e30)   # logits are unbounded below; -1 is not enough

    # Working copy for this batch element; selection/comparison in f32.
    work_ref[...] = logits_ref[0].astype(jnp.float32)

    # Lane-dense iotas.
    q_iota = jax.lax.broadcasted_iota(jnp.int32, (1, Q), 1)
    c_iota = jax.lax.broadcasted_iota(jnp.int32, (1, C), 1)
    ns_iota = jax.lax.broadcasted_iota(jnp.int32, (1, NS), 1)

    # Per-query running max over classes, lane-dense (1, Q); seeded by the
    # wrapper (XLA) so no in-kernel sublane->lane relayout is required.
    rowmax0 = rowmax_ref[0].astype(jnp.float32)                       # (1, Q)
    scores0 = jnp.zeros((1, NS), jnp.float32)                         # raw logits
    labels0 = jnp.zeros((1, NS), jnp.int32)

    def body(k, carry):
        rowmax, sc, lb = carry
        # Global max over the remaining elements: one lane reduce over (1, Q).
        mv = jnp.max(rowmax)                                          # f32
        # First row attaining mv (matches lax.top_k flat-index tie-break).
        q_idx = jnp.min(jnp.where(rowmax >= mv, q_iota, Q))           # i32
        # Only that row is touched: O(C) work.
        row = work_ref[pl.ds(q_idx, 1), :]                            # (1, C)
        c_idx = jnp.min(jnp.where(row >= mv, c_iota, C))              # i32

        # Record raw score / label; gather the selected box row into scratch.
        sc = jnp.where(ns_iota == k, mv, sc)
        lb = jnp.where(ns_iota == k, c_idx, lb)
        bsel_ref[pl.ds(k, 1), :] = bbox_ref[0, pl.ds(q_idx, 1), :].astype(
            jnp.float32)

        # Mask out the selected element and refresh only that row's max.
        row_new = jnp.where(c_iota == c_idx, NEG, row)
        work_ref[pl.ds(q_idx, 1), :] = row_new
        rowmax = jnp.where(q_iota == q_idx, jnp.max(row_new), rowmax)
        return rowmax, sc, lb

    _, raw_scores, labels = jax.lax.fori_loop(
        0, NS, body, (rowmax0, scores0, labels0))

    # One vectorised sigmoid on the NS selected logits only.
    scores_ref[0, :, :] = jax.nn.sigmoid(raw_scores)                  # (1, NS)
    labels_ref[0, :, :] = labels                                      # (1, NS)

    # cxcywh -> xyxy on the NS selected rows only (VPU ops, no MXU, no consts).
    sel = bsel_ref[...]                                               # (NS, 4)
    cx = sel[:, 0:1]
    cy = sel[:, 1:2]
    w = sel[:, 2:3]
    h = sel[:, 3:4]
    xyxy = jnp.concatenate(
        [cx - 0.5 * w, cy - 0.5 * h, cx + 0.5 * w, cy + 0.5 * h], axis=1)
    boxes_ref[0, :, :] = xyxy * scale_ref[0, :, :]                    # (NS, 4)


def post_process(pred_logits, pred_boxes, target_sizes,
                 num_select=8, detections_per_img=8):
    """JAX/Pallas equivalent of PostProcess.forward (default path)."""
    B, Q, C = pred_logits.shape
    assert target_sizes.shape == (B, 2)
    NS = num_select

    img_h = target_sizes[:, 0].astype(jnp.float32)
    img_w = target_sizes[:, 1].astype(jnp.float32)
    scale_fct = jnp.stack([img_w, img_h, img_w, img_h], axis=1).reshape(B, 1, 4)

    # Per-query max over classes, computed once by XLA so the kernel's running
    # row-max lives lane-dense as (1, Q) with no in-kernel relayout.
    row_max = jnp.max(pred_logits, axis=2).astype(jnp.float32).reshape(B, 1, Q)

    kernel = functools.partial(_postprocess_kernel, NS)

    scores, labels, boxes = pl.pallas_call(
        kernel,
        grid=(B,),
        in_specs=[
            pl.BlockSpec((1, Q, C), lambda b: (b, 0, 0)),
            pl.BlockSpec((1, Q, 4), lambda b: (b, 0, 0)),
            pl.BlockSpec((1, 1, Q), lambda b: (b, 0, 0)),
            pl.BlockSpec((1, 1, 4), lambda b: (b, 0, 0)),
        ],
        out_specs=[
            pl.BlockSpec((1, 1, NS), lambda b: (b, 0, 0)),
            pl.BlockSpec((1, 1, NS), lambda b: (b, 0, 0)),
            pl.BlockSpec((1, NS, 4), lambda b: (b, 0, 0)),
        ],
        out_shape=[
            jax.ShapeDtypeStruct((B, 1, NS), jnp.float32),
            jax.ShapeDtypeStruct((B, 1, NS), jnp.int32),
            jax.ShapeDtypeStruct((B, NS, 4), jnp.float32),
        ],
        scratch_shapes=[
            pltpu.VMEM((Q, C), jnp.float32),    # masked working copy
            pltpu.VMEM((NS, 4), jnp.float32),   # gathered boxes (cxcywh)
        ],
        compiler_params=pltpu.CompilerParams(
            dimension_semantics=("parallel",)),
    )(pred_logits, pred_boxes, row_max, scale_fct)   # native dtypes, no pre-cast

    scores = scores.reshape(B, NS)
    labels = labels.reshape(B, NS)

    # results = [{'scores': s[:d], 'labels': l[:d], 'boxes': b[:d]} ...]
    d = detections_per_img
    results = [{"scores": scores[b, :d],
                "labels": labels[b, :d],
                "boxes": boxes[b, :d]} for b in range(B)]
    return results


def post_process_ref(pred_logits, pred_boxes, target_sizes, num_select=8):
    """Pure-JAX reference with the same semantics (sanity check)."""
    B, Q, C = pred_logits.shape
    prob = jax.nn.sigmoid(pred_logits.astype(jnp.float32))
    topk_values, topk_indexes = jax.lax.top_k(prob.reshape(B, -1), num_select)
    topk_boxes = topk_indexes // C
    labels = topk_indexes % C
    boxes = jnp.take_along_axis(pred_boxes.astype(jnp.float32),
                                topk_boxes[..., None], axis=1)
    cx, cy, w, h = boxes[..., 0], boxes[..., 1], boxes[..., 2], boxes[..., 3]
    boxes_xyxy = jnp.stack([cx - 0.5 * w, cy - 0.5 * h,
                            cx + 0.5 * w, cy + 0.5 * h], axis=-1)
    img_h = target_sizes[:, 0].astype(jnp.float32)
    img_w = target_sizes[:, 1].astype(jnp.float32)
    scale = jnp.stack([img_w, img_h, img_w, img_h], axis=1)
    return topk_values, labels, boxes_xyxy * scale[:, None, :]


if __name__ == "__main__":
    B, Q, C = 2, 16, 8
    NUM_SELECT = 8

    key = jax.random.PRNGKey(0)
    k1, k2 = jax.random.split(key)
    pred_logits = jax.random.normal(k1, (B, Q, C), dtype=jnp.float32)
    pred_boxes = jax.random.uniform(k2, (B, Q, 4), dtype=jnp.float32,
                                    minval=0.05, maxval=0.95)
    target_sizes = jnp.array([[64.0, 96.0], [80.0, 72.0]], dtype=jnp.float32)

    results = post_process(pred_logits, pred_boxes, target_sizes,
                           num_select=NUM_SELECT, detections_per_img=NUM_SELECT)
    jax.block_until_ready(results)

    # Sanity check against the pure-JAX reference.
    ref_scores, ref_labels, ref_boxes = post_process_ref(
        pred_logits, pred_boxes, target_sizes, num_select=NUM_SELECT)
    for b in range(B):
        assert jnp.allclose(results[b]["scores"], ref_scores[b],
                            rtol=1e-4, atol=1e-5), "score mismatch"
        assert jnp.array_equal(results[b]["labels"],
                               ref_labels[b].astype(jnp.int32)), "label mismatch"
        assert jnp.allclose(results[b]["boxes"], ref_boxes[b],
                            rtol=1e-4, atol=1e-3), "box mismatch"

    print("KERNEL_OK")
</pallas_src>

<mosaic_0001>
module attributes {stable_mosaic.version = 11 : i64} {
  func.func @_postprocess_kernel(%arg0: i32, %arg1: memref<1x16x8xf32, #tpu.memory_space<vmem>>, %arg2: memref<1x16x4xf32, #tpu.memory_space<vmem>>, %arg3: memref<1x1x16xf32, #tpu.memory_space<vmem>>, %arg4: memref<1x1x4xf32, #tpu.memory_space<vmem>>, %arg5: memref<1x1x8xf32, #tpu.memory_space<vmem>>, %arg6: memref<1x1x8xi32, #tpu.memory_space<vmem>>, %arg7: memref<1x8x4xf32, #tpu.memory_space<vmem>>, %arg8: memref<16x8xf32, #tpu.memory_space<vmem>>, %arg9: memref<8x4xf32, #tpu.memory_space<vmem>>) attributes {dimension_semantics = [#tpu.dimension_semantics<parallel>], iteration_bounds = array<i64: 2>, scalar_prefetch = 0 : i64, scratch_operands = 2 : i64, tpu.core_type = #tpu.core_type<tc>, window_params = [{transform_indices = @transform_0, window_bounds = array<i64: 1, 16, 8>}, {transform_indices = @transform_1, window_bounds = array<i64: 1, 16, 4>}, {transform_indices = @transform_2, window_bounds = array<i64: 1, 1, 16>}, {transform_indices = @transform_3, window_bounds = array<i64: 1, 1, 4>}, {transform_indices = @transform_4, window_bounds = array<i64: 1, 1, 8>}, {transform_indices = @transform_5, window_bounds = array<i64: 1, 1, 8>}, {transform_indices = @transform_6, window_bounds = array<i64: 1, 8, 4>}]} {
    %c0 = arith.constant 0 : index
    %c0_0 = arith.constant 0 : index
    %c0_1 = arith.constant 0 : index
    %0 = vector.load %arg1[%c0, %c0_0, %c0_1] : memref<1x16x8xf32, #tpu.memory_space<vmem>>, vector<1x16x8xf32>
    %1 = vector.shape_cast %0 : vector<1x16x8xf32> to vector<16x8xf32>
    %c0_2 = arith.constant 0 : index
    %c0_3 = arith.constant 0 : index
    %2 = vector.load %arg8[%c0_2, %c0_3] : memref<16x8xf32, #tpu.memory_space<vmem>>, vector<16x8xf32>
    tpu.vector_store %arg8[%c0_2, %c0_3], %1 {strides = array<i32>} : memref<16x8xf32, #tpu.memory_space<vmem>>, vector<16x8xf32>,
    %3 = tpu.iota {dimensions = array<i32: 1>} : vector<1x16xi32>
    %4 = tpu.iota {dimensions = array<i32: 1>} : vector<1x8xi32>
    %5 = tpu.iota {dimensions = array<i32: 1>} : vector<1x8xi32>
    %c0_4 = arith.constant 0 : index
    %c0_5 = arith.constant 0 : index
    %c0_6 = arith.constant 0 : index
    %6 = vector.load %arg3[%c0_4, %c0_5, %c0_6] : memref<1x1x16xf32, #tpu.memory_space<vmem>>, vector<1x1x16xf32>
    %7 = vector.shape_cast %6 : vector<1x1x16xf32> to vector<1x16xf32>
    %cst = arith.constant 0.000000e+00 : f32
    %8 = vector.broadcast %cst : f32 to vector<1x8xf32>
    %c0_i32 = arith.constant 0 : i32
    %9 = vector.broadcast %c0_i32 : i32 to vector<1x8xi32>
    %cst_7 = arith.constant -1.000000e+30 : f32
    %c0_i32_8 = arith.constant 0 : i32
    %c8_i32 = arith.constant 8 : i32
    %10 = arith.addi %c0_i32_8, %c8_i32 : i32
    %c1_i32 = arith.constant 1 : i32
    %11:3 = scf.for %arg10 = %c0_i32_8 to %10 step %c1_i32 iter_args(%arg11 = %7, %arg12 = %8, %arg13 = %9) -> (vector<1x16xf32>, vector<1x8xf32>, vector<1x8xi32>)  : i32 {
      %48 = vector.shape_cast %arg11 : vector<1x16xf32> to vector<1x1x16xf32>
      %cst_29 = arith.constant dense<0xFF800000> : vector<1xf32>
      %49 = vector.multi_reduction <maximumf>, %48, %cst_29 [1, 2] : vector<1x1x16xf32> to vector<1xf32>
      %50 = vector.shape_cast %49 : vector<1xf32> to vector<1x1x1xf32>
      %51 = vector.extract %50[0, 0, 0] : f32 from vector<1x1x1xf32>
      %52 = vector.broadcast %51 : f32 to vector<1x16xf32>
      %53 = arith.cmpf oge, %arg11, %52 : vector<1x16xf32>
      %c16_i32 = arith.constant 16 : i32
      %54 = vector.broadcast %c16_i32 : i32 to vector<1x16xi32>
      %55 = arith.select %53, %3, %54 : vector<1x16xi1>, vector<1x16xi32>
      %56 = vector.shape_cast %55 : vector<1x16xi32> to vector<1x1x16xi32>
      %cst_30 = arith.constant dense<2147483647> : vector<1xi32>
      %57 = vector.multi_reduction <minsi>, %56, %cst_30 [1, 2] : vector<1x1x16xi32> to vector<1xi32>
      %58 = vector.shape_cast %57 : vector<1xi32> to vector<1x1x1xi32>
      %59 = vector.extract %58[0, 0, 0] : i32 from vector<1x1x1xi32>
      %60 = arith.index_cast %59 : i32 to index
      %c0_31 = arith.constant 0 : index
      %61 = vector.load %arg8[%60, %c0_31] : memref<16x8xf32, #tpu.memory_space<vmem>>, vector<1x8xf32>
      %62 = vector.broadcast %51 : f32 to vector<1x8xf32>
      %63 = arith.cmpf oge, %61, %62 : vector<1x8xf32>
      %c8_i32_32 = arith.constant 8 : i32
      %64 = vector.broadcast %c8_i32_32 : i32 to vector<1x8xi32>
      %65 = arith.select %63, %4, %64 : vector<1x8xi1>, vector<1x8xi32>
      %66 = vector.shape_cast %65 : vector<1x8xi32> to vector<1x1x8xi32>
      %cst_33 = arith.constant dense<2147483647> : vector<1xi32>
      %67 = vector.multi_reduction <minsi>, %66, %cst_33 [1, 2] : vector<1x1x8xi32> to vector<1xi32>
      %68 = vector.shape_cast %67 : vector<1xi32> to vector<1x1x1xi32>
      %69 = vector.extract %68[0, 0, 0] : i32 from vector<1x1x1xi32>
      %70 = vector.broadcast %arg10 : i32 to vector<1x8xi32>
      %71 = arith.cmpi eq, %5, %70 : vector<1x8xi32>
      %72 = vector.broadcast %51 : f32 to vector<1x8xf32>
      %73 = arith.select %71, %72, %arg12 : vector<1x8xi1>, vector<1x8xf32>
      %74 = vector.broadcast %arg10 : i32 to vector<1x8xi32>
      %75 = arith.cmpi eq, %5, %74 : vector<1x8xi32>
      %76 = vector.broadcast %69 : i32 to vector<1x8xi32>
      %77 = arith.select %75, %76, %arg13 : vector<1x8xi1>, vector<1x8xi32>
      %c0_34 = arith.constant 0 : index
      %78 = arith.index_cast %59 : i32 to index
      %c0_35 = arith.constant 0 : index
      %79 = vector.load %arg2[%c0_34, %78, %c0_35] : memref<1x16x4xf32, #tpu.memory_space<vmem>>, vector<1x1x4xf32>
      %80 = vector.shape_cast %79 : vector<1x1x4xf32> to vector<1x4xf32>
      %81 = arith.index_cast %arg10 : i32 to index
      %c0_36 = arith.constant 0 : index
      %82 = vector.load %arg9[%81, %c0_36] : memref<8x4xf32, #tpu.memory_space<vmem>>, vector<1x4xf32>
      tpu.vector_store %arg9[%81, %c0_36], %80 {strides = array<i32>} : memref<8x4xf32, #tpu.memory_space<vmem>>, vector<1x4xf32>,
      %83 = vector.broadcast %69 : i32 to vector<1x8xi32>
      %84 = arith.cmpi eq, %4, %83 : vector<1x8xi32>
      %85 = vector.broadcast %cst_7 : f32 to vector<1x8xf32>
      %86 = arith.select %84, %85, %61 : vector<1x8xi1>, vector<1x8xf32>
      %87 = arith.index_cast %59 : i32 to index
      %c0_37 = arith.constant 0 : index
      %88 = vector.load %arg8[%87, %c0_37] : memref<16x8xf32, #tpu.memory_space<vmem>>, vector<1x8xf32>
      tpu.vector_store %arg8[%87, %c0_37], %86 {strides = array<i32>} : memref<16x8xf32, #tpu.memory_space<vmem>>, vector<1x8xf32>,
      %89 = vector.broadcast %59 : i32 to vector<1x16xi32>
      %90 = arith.cmpi eq, %3, %89 : vector<1x16xi32>
      %91 = vector.shape_cast %86 : vector<1x8xf32> to vector<1x1x8xf32>
      %cst_38 = arith.constant dense<0xFF800000> : vector<1xf32>
      %92 = vector.multi_reduction <maximumf>, %91, %cst_38 [1, 2] : vector<1x1x8xf32> to vector<1xf32>
      %93 = vector.shape_cast %92 : vector<1xf32> to vector<1x1x1xf32>
      %94 = vector.extract %93[0, 0, 0] : f32 from vector<1x1x1xf32>
      %95 = vector.broadcast %94 : f32 to vector<1x16xf32>
      %96 = arith.select %90, %95, %arg11 : vector<1x16xi1>, vector<1x16xf32>
      scf.yield %96, %73, %77 : vector<1x16xf32>, vector<1x8xf32>, vector<1x8xi32>
    }
    %c8_i32_9 = arith.constant 8 : i32
    %12 = arith.negf %11#1 : vector<1x8xf32>
    %13 = math.exp %12 : vector<1x8xf32>
    %cst_10 = arith.constant 1.000000e+00 : f32
    %14 = vector.broadcast %cst_10 : f32 to vector<1x8xf32>
    %15 = arith.addf %14, %13 : vector<1x8xf32>
    %16 = arith.divf %14, %15 : vector<1x8xf32>
    %c0_11 = arith.constant 0 : index
    %c0_12 = arith.constant 0 : index
    %c0_13 = arith.constant 0 : index
    %17 = vector.load %arg5[%c0_11, %c0_12, %c0_13] : memref<1x1x8xf32, #tpu.memory_space<vmem>>, vector<1x1x8xf32>
    %18 = vector.shape_cast %17 : vector<1x1x8xf32> to vector<1x8xf32>
    %19 = vector.shape_cast %16 : vector<1x8xf32> to vector<1x1x8xf32>
    tpu.vector_store %arg5[%c0_11, %c0_12, %c0_13], %19 {strides = array<i32>} : memref<1x1x8xf32, #tpu.memory_space<vmem>>, vector<1x1x8xf32>,
    %c0_14 = arith.constant 0 : index
    %c0_15 = arith.constant 0 : index
    %c0_16 = arith.constant 0 : index
    %20 = vector.load %arg6[%c0_14, %c0_15, %c0_16] : memref<1x1x8xi32, #tpu.memory_space<vmem>>, vector<1x1x8xi32>
    %21 = vector.shape_cast %20 : vector<1x1x8xi32> to vector<1x8xi32>
    %22 = vector.shape_cast %11#2 : vector<1x8xi32> to vector<1x1x8xi32>
    tpu.vector_store %arg6[%c0_14, %c0_15, %c0_16], %22 {strides = array<i32>} : memref<1x1x8xi32, #tpu.memory_space<vmem>>, vector<1x1x8xi32>,
    %c0_17 = arith.constant 0 : index
    %c0_18 = arith.constant 0 : index
    %23 = vector.load %arg9[%c0_17, %c0_18] : memref<8x4xf32, #tpu.memory_space<vmem>>, vector<8x4xf32>
    %24 = vector.extract_strided_slice %23 {offsets = [0, 0], sizes = [8, 1], strides = [1, 1]} : vector<8x4xf32> to vector<8x1xf32>
    %25 = vector.extract_strided_slice %23 {offsets = [0, 1], sizes = [8, 1], strides = [1, 1]} : vector<8x4xf32> to vector<8x1xf32>
    %26 = vector.extract_strided_slice %23 {offsets = [0, 2], sizes = [8, 1], strides = [1, 1]} : vector<8x4xf32> to vector<8x1xf32>
    %27 = vector.extract_strided_slice %23 {offsets = [0, 3], sizes = [8, 1], strides = [1, 1]} : vector<8x4xf32> to vector<8x1xf32>
    %cst_19 = arith.constant 5.000000e-01 : f32
    %28 = vector.broadcast %cst_19 : f32 to vector<8x1xf32>
    %29 = arith.mulf %28, %26 : vector<8x1xf32>
    %30 = arith.subf %24, %29 : vector<8x1xf32>
    %cst_20 = arith.constant 5.000000e-01 : f32
    %31 = vector.broadcast %cst_20 : f32 to vector<8x1xf32>
    %32 = arith.mulf %31, %27 : vector<8x1xf32>
    %33 = arith.subf %25, %32 : vector<8x1xf32>
    %cst_21 = arith.constant 5.000000e-01 : f32
    %34 = vector.broadcast %cst_21 : f32 to vector<8x1xf32>
    %35 = arith.mulf %34, %26 : vector<8x1xf32>
    %36 = arith.addf %24, %35 : vector<8x1xf32>
    %cst_22 = arith.constant 5.000000e-01 : f32
    %37 = vector.broadcast %cst_22 : f32 to vector<8x1xf32>
    %38 = arith.mulf %37, %27 : vector<8x1xf32>
    %39 = arith.addf %25, %38 : vector<8x1xf32>
    %40 = tpu.concatenate %30, %33, %36, %39 in 1 : vector<8x1xf32>, vector<8x1xf32>, vector<8x1xf32>, vector<8x1xf32> -> vector<8x4xf32>
    %c0_23 = arith.constant 0 : index
    %c0_24 = arith.constant 0 : index
    %c0_25 = arith.constant 0 : index
    %41 = vector.load %arg4[%c0_23, %c0_24, %c0_25] : memref<1x1x4xf32, #tpu.memory_space<vmem>>, vector<1x1x4xf32>
    %42 = vector.shape_cast %41 : vector<1x1x4xf32> to vector<1x4xf32>
    %43 = vector.broadcast %42 : vector<1x4xf32> to vector<8x4xf32>
    %44 = arith.mulf %40, %43 : vector<8x4xf32>
    %c0_26 = arith.constant 0 : index
    %c0_27 = arith.constant 0 : index
    %c0_28 = arith.constant 0 : index
    %45 = vector.load %arg7[%c0_26, %c0_27, %c0_28] : memref<1x8x4xf32, #tpu.memory_space<vmem>>, vector<1x8x4xf32>
    %46 = vector.shape_cast %45 : vector<1x8x4xf32> to vector<8x4xf32>
    %47 = vector.shape_cast %44 : vector<8x4xf32> to vector<1x8x4xf32>
    tpu.vector_store %arg7[%c0_26, %c0_27, %c0_28], %47 {strides = array<i32>} : memref<1x8x4xf32, #tpu.memory_space<vmem>>, vector<1x8x4xf32>,
    return
  }
  func.func @transform_0(%arg0: i32) -> (i32, i32, i32) {
    %c0_i32 = arith.constant 0 : i32
    %c0_i32_0 = arith.constant 0 : i32
    %c0_i32_1 = arith.constant 0 : i32
    return %arg0, %c0_i32, %c0_i32_0 : i32, i32, i32
  }
  func.func @transform_1(%arg0: i32) -> (i32, i32, i32) {
    %c0_i32 = arith.constant 0 : i32
    %c0_i32_0 = arith.constant 0 : i32
    %c0_i32_1 = arith.constant 0 : i32
    return %arg0, %c0_i32, %c0_i32_0 : i32, i32, i32
  }
  func.func @transform_2(%arg0: i32) -> (i32, i32, i32) {
    %c0_i32 = arith.constant 0 : i32
    %c0_i32_0 = arith.constant 0 : i32
    %c0_i32_1 = arith.constant 0 : i32
    return %arg0, %c0_i32, %c0_i32_0 : i32, i32, i32
  }
  func.func @transform_3(%arg0: i32) -> (i32, i32, i32) {
    %c0_i32 = arith.constant 0 : i32
    %c0_i32_0 = arith.constant 0 : i32
    %c0_i32_1 = arith.constant 0 : i32
    return %arg0, %c0_i32, %c0_i32_0 : i32, i32, i32
  }
  func.func @transform_4(%arg0: i32) -> (i32, i32, i32) {
    %c0_i32 = arith.constant 0 : i32
    %c0_i32_0 = arith.constant 0 : i32
    %c0_i32_1 = arith.constant 0 : i32
    return %arg0, %c0_i32, %c0_i32_0 : i32, i32, i32
  }
  func.func @transform_5(%arg0: i32) -> (i32, i32, i32) {
    %c0_i32 = arith.constant 0 : i32
    %c0_i32_0 = arith.constant 0 : i32
    %c0_i32_1 = arith.constant 0 : i32
    return %arg0, %c0_i32, %c0_i32_0 : i32, i32, i32
  }
  func.func @transform_6(%arg0: i32) -> (i32, i32, i32) {
    %c0_i32 = arith.constant 0 : i32
    %c0_i32_0 = arith.constant 0 : i32
    %c0_i32_1 = arith.constant 0 : i32
    return %arg0, %c0_i32, %c0_i32_0 : i32, i32, i32
  }
}

</mosaic_0001>

<bundles_post_ra>
// kernel: tpu_custom_call.1
= control target key start
LH: loop header
LB: loop body
LE: loop exit
PB: predicated region body
PF: predicated region fallthrough
CT: control target
= control target key end

     0   :  { %s1166_s0 = inlined_call_operand.vmem [shape: f32[2,16,8], index: 0, kind: input, shape index: {}]   ;;  %s1167_s1 = inlined_call_operand.vmem [shape: f32[2,16,4], index: 1, kind: input, shape index: {}]   ;;  %s1168_s2 = inlined_call_operand.vmem [shape: f32[2,1,16], index: 2, kind: input, shape index: {}]   ;;  %s1169_s3 = inlined_call_operand.vmem [shape: f32[2,1,4], index: 3, kind: input, shape index: {}]   ;;  %s1170_s4 = inlined_call_operand.hbm [shape: f32[2,1,8], index: 4, kind: output, shape index: {0}]   ;;  %s1171_s5 = inlined_call_operand.hbm [shape: s32[2,1,8], index: 5, kind: output, shape index: {1}]   ;;  %s1172_s6 = inlined_call_operand.vmem [shape: f32[2,8,4], index: 6, kind: output, shape index: {2}]  }
   0x1   :  { %1173 = sst [smem:[#allocation11_spill]] %s1168_s2 }
   0x2   :  { %12 = vsyncpa [#allocation5], 0 }
   0x3   :  { %14 = vsyncpa [#allocation5 + $0x1], 0 }
   0x4   :  { %15 = vsyncpa [#allocation7], 0 }
   0x5   :  { %17 = vsyncpa [#allocation7 + $0x1], 0  ;;  %s930_s21 = smov 0   ;;  %s932_s22 = smov 0  }
   0x6   :  { %s934_s23 = smov 0   ;;  %s936_s24 = smov 0  }
   0x7 LB: > { %s951_s25 = sadd.s32 4294967295, %s873_s24   ;;  %s656_s26 = sadd.s32 4294967294, %s873_s24   ;;  %s873_s24 = sphi %s936_s24, %s1188_s24   ;;  %s869_s23 = sphi %s934_s23, %s1187_s23   ;;  %s865_s22 = sphi %s932_s22, %s1186_s22   ;;  %s861_s21 = sphi %s930_s21, %s1185_s21  }
   0x8   : > { %s955_s27 = sadd.s32 1, %s873_s24   ;;  %s134_s28 = sadd.s32 1, %s869_s23 }
   0x9   : > { %s131_s29 = ssub.s32 %s873_s24, %s955_s27  ;;  %p144_p0 = scmp.ne.s32.totalorder %s869_s23, %s865_s22 }
   0xa   : > { %p132_p1 = scmp.eq.s32.totalorder %s131_s29, 0  ;;  %p145_p2 = scmp.eq.s32.totalorder %s951_s25, 1 }
   0xb   : > { %p150_p3 = scmp.ne.s32.totalorder %s865_s22, %s861_s21  ;;  %p151_p4 = scmp.eq.s32.totalorder %s656_s26, 1 }
   0xc   : > { %s966_s30 = scalar_select %p132_p1, %s869_s23, %s134_s28  }
   0xd   : > { %p968_p5 = por %p145_p2, %p144_p0  ;;  %p972_p6 = por %p151_p4, %p150_p3 }
   0xe   : > { %1174 = sst [smem:[#allocation10_spill]] %s966_s30  ;;  %p659_p7 = scmp.ge.s32.totalorder %s873_s24, 1 }
   0xf   : > { %p249_p8 = scmp.lt.s32.totalorder %s873_s24, 3 }
  0x11   : > { %p250_p9 = pnand %p659_p7, %p249_p8 }
  0x12   : > { %s979_s9 = sand.u32 (!%p250_p9), 1, %s865_s22   ;;  %p297_p10 = scmp.lt.s32.totalorder (!%p250_p9), %s951_s25, 1  ;;  %v322_v0 = vlaneseq (!%p250_p9)  ;;  %vm319_vm0 = vcmask (!%p250_p9), 64512   ;;  %v1012_v5 = vmov (!%p250_p9), 0   ;;  %v1014_v6 = vmov (!%p250_p9), 0.0  }
  0x13   : > { %253 = sbr.rel (%p250_p9) target bundleno = 1355 (0x54b), region = 36  ;;  %s1177_s2 = sld [smem:[#allocation11_spill]] (!%p250_p9) }
  0x14   : > { %v985_v1 = vand.u32 (!%p250_p9), 127, %v322_v0  ;;  %s284_s15 = scalar_lea.vmem (!%p250_p9), [#allocation4], %s979_s9  ;;  %s290_s16 = scalar_lea.vmem (!%p250_p9), [#allocation6], %s979_s9 }
  0x1a   : > { %s983_s10 = scalar_select %p297_p10, %s951_s25, 1 }
  0x1c   : > { %s671_s11 = sshll.u32 %s983_s10, 4  ;;  %s309_s14 = scalar_lea.vmem %s1177_s2, %s983_s10 }
  0x1d   : > { %s301_s17 = scalar_lea.vmem %s1166_s0, %s671_s11  ;;  %s998_s20 = scalar_lea.vmem %s1167_s1, %s671_s11  ;;  %v324_v2 = vld [vmem:[%s309_s14] sm:$0x1]  }
  0x1e   : > { %s664_s30 = sshll.u32 %s983_s10, 3  ;;  %v317_v3 = vld [vmem:[%s301_s17] sm:$0xff]  ;;  %v318_v4 = vld [vmem:[%s301_s17 + $0x8] sm:$0xff]  ;;  %s1018_s11 = smov 0  }
  0x1f   : > { %s1008_s2 = scalar_lea.vmem %s1172_s6, %s664_s30  ;;  %320 = vst.msk [vmem:[#allocation2] sm:$0xff] %vm319_vm0, %v317_v3  ;;  %321 = vst.msk [vmem:[#allocation2 + $0x8] sm:$0xff] %vm319_vm0, %v318_v4 }
  0x20 LB: >> { %vm334_vm1 = vcmask 122880   ;;  %v403_v15 = vstv %s889_s11  ;;  %vm411_vm8 = vcmask 24576   ;;  %vm377_vm9 = vcmask 57344   ;;  %s410_s19 = scalar_lea.vmem [#allocation3], %s889_s11  ;;  %s330_s11 = sadd.s32 1, %s889_s11   ;;  %s889_s11 = sphi %s1018_s11, %s330_s11   ;;  %v885_v2 = vphi %v324_v2, %v429_v2   ;;  %v881_v6 = vphi %v1014_v6, %v1182_v6   ;;  %v877_v5 = vphi %v1012_v5, %v1181_v5  }
  0x21   : >> { %v335_v7 = vsel %vm334_vm1, %v885_v2, -inf  ;;  %vm1034_vm2 = vcmp.eq.s32.totalorder %v985_v1, %v403_v15  ;;  %p327_p11 = scmp.ge.s32.totalorder %s330_s11, 8  }
  0x22   : >> { %336 = vmax.xlane.f32.xlu0 %v335_v7  ;;  %s891_s12 = smov (%p327_p11), 126   ;;  %s486_s13 = sshll.u32 (%p327_p11), %s284_s15, 4  ;;  %s487_s13 = int_to_ptr.vmem [resolvable:$true] %s486_s13 }
  0xaf   : >> { %v337_v8 = vpop.xlane.xlu0 %336 }
  0xb0   : >> { %v338_v9 = vrot.slane %v337_v8, 4 }
  0xb2   : >> { %v339_v10 = vmax.f32 %v337_v8, %v338_v9 }
  0xb4   : >> { %v340_v11 = vrot.slane %v339_v10, 2 }
  0xb6   : >> { %v341_v12 = vmax.f32 %v339_v10, %v340_v11 }
  0xb8   : >> { %v342_v13 = vrot.slane %v341_v12, 1 }
  0xba   : >> { %v343_v14 = vmax.f32 %v341_v12, %v342_v13 }
  0xbc   : >> { %673 = vpush %v343_v14 }
  0xed   : >> { %s674_s30 = spop %673 }
  0xee   : >> { %v345_v17 = vstv %s674_s30 }
  0xef   : >> { %vm346_vm3 = vcmp.ge.f32.partialorder %v885_v2, %v345_v17  ;;  %v1041_v6 = vsel %vm1034_vm2, %v345_v17, %v881_v6  }
  0xf0   : >> { %v1180_v18 = vmov %v1041_v6  ;;  %v347_v19 = vsel %vm346_vm3, %v985_v1, 16 }
  0xf1   : >> { %v348_v20 = vsel %vm334_vm1, %v347_v19, 2147483647 }
  0xf2   : >> { %v350_v21 = vshra.s32 %v348_v20, 16  ;;  %v349_v23 = vand.u32 65535, %v348_v20 }
  0xf4   : >> { %v352_v22 = vcvt.s32.f32 %v350_v21  ;;  %v351_v25 = vcvt.s32.f32 %v349_v23 }
  0xf6   : >> { %353 = vmin.xlane.f32.xlu0 %v352_v22 }
 0x183   : >> { %v354_v24 = vpop.xlane.xlu0 %353 }
 0x184   : >> { %vm355_vm4 = vcmp.eq.f32.partialorder %v352_v22, %v354_v24  ;;  %v360_v27 = vcvt.f32.s32 %v354_v24 }
 0x185   : >> { %v356_v26 = vsel %vm355_vm4, %v351_v25, inf }
 0x186   : >> { %357 = vmin.xlane.f32.xlu1 %v356_v26  ;;  %v361_v29 = vshll.u32 %v360_v27, 16 }
 0x213   : >> { %v358_v28 = vpop.xlane.xlu1 %357 }
 0x214   : >> { %v359_v30 = vcvt.f32.s32 %v358_v28 }
 0x216   : >> { %v362_v31 = vadd.s32 %v361_v29, %v359_v30 }
 0x218   : >> { %v363_v32 = vrot.slane %v362_v31, 4 }
 0x21a   : >> { %vm364_vm5 = vcmp.lt.s32.totalorder %v362_v31, %v363_v32 }
 0x21b   : >> { %v365_v33 = vsel %vm364_vm5, %v362_v31, %v363_v32 }
 0x21c   : >> { %v366_v34 = vrot.slane %v365_v33, 2 }
 0x21e   : >> { %vm367_vm6 = vcmp.lt.s32.totalorder %v365_v33, %v366_v34 }
 0x21f   : >> { %v368_v35 = vsel %vm367_vm6, %v365_v33, %v366_v34 }
 0x220   : >> { %v369_v36 = vrot.slane %v368_v35, 1 }
 0x222   : >> { %vm370_vm7 = vcmp.lt.s32.totalorder %v368_v35, %v369_v36 }
 0x223   : >> { %v371_v37 = vsel %vm370_vm7, %v368_v35, %v369_v36 }
 0x224   : >> { %675 = vpush %v371_v37 }
 0x255   : >> { %s1045_s14 = spop %675 }
 0x256   : >> { %s408_s17 = scalar_lea.vmem %s998_s20, %s1045_s14  ;;  %s373_s18 = scalar_lea.vmem [#allocation2], %s1045_s14  ;;  %v416_v9 = vstv %s1045_s14 }
 0x257   : >> { %v374_v38 = vld [vmem:[%s373_s18] sm:$0x1]  ;;  %vm417_vm0 = vcmp.eq.s32.totalorder %v985_v1, %v416_v9  ;;  %s667_s20 = sshll.u32 (%p327_p11), %s951_s25, 4 }
 0x258   : >> { %v409_v39 = vld [vmem:[%s408_s17] sm:$0x1]  ;;  %vm375_vm10 = vcmp.ge.f32.partialorder %v374_v38, %v345_v17  ;;  %s1094_s14 = scalar_lea.hbm (%p327_p11), %s1170_s4, %s667_s20  ;;  %s466_s17 = scalar_lea.sflag (%p327_p11), [#allocation5], %s979_s9 }
 0x259   : >> { %412 = vst.msk [vmem:[%s410_s19] sm:$0x1] %vm411_vm8, %v409_v39  ;;  %v376_v40 = vsel %vm375_vm10, %v985_v1, 8  ;;  %s892_s19 = smov (%p327_p11), [#allocation4]  }
 0x25a   : >> { %v378_v41 = vsel %vm377_vm9, %v376_v40, 2147483647 }
 0x25b   : >> { %v380_v42 = vshra.s32 %v378_v41, 16  ;;  %v379_v44 = vand.u32 65535, %v378_v41 }
 0x25d   : >> { %v382_v43 = vcvt.s32.f32 %v380_v42  ;;  %v381_v46 = vcvt.s32.f32 %v379_v44 }
 0x25f   : >> { %383 = vmin.xlane.f32.xlu1 %v382_v43 }
 0x260   : > { %v1076_v10 = vld [vmem:[#allocation3] sm:$0xff] (%p327_p11) }
 0x261   : > { %v440_v11 = vmul.f32 (%p327_p11), 0.5, %v1076_v10 }
 0x2ec   : >> { %v384_v45 = vpop.xlane.xlu1 %383 }
 0x2ed   : >> { %vm385_vm11 = vcmp.eq.f32.partialorder %v382_v43, %v384_v45  ;;  %v390_v48 = vcvt.f32.s32 %v384_v45 }
 0x2ee   : >> { %v386_v47 = vsel %vm385_vm11, %v381_v46, inf }
 0x2ef   : >> { %387 = vmin.xlane.f32.xlu0 %v386_v47  ;;  %v391_v50 = vshll.u32 %v390_v48, 16 }
 0x305   : > { %442 = vrot.lane.b32.xlu0 (%p327_p11), %v440_v11, %s891_s12 }
 0x37c   : >> { %v388_v49 = vpop.xlane.xlu0 %387 }
 0x37d   : >> { %v389_v51 = vcvt.f32.s32 %v388_v49 }
 0x37f   : >> { %v392_v52 = vadd.s32 %v391_v50, %v389_v51 }
 0x381   : >> { %v393_v53 = vrot.slane %v392_v52, 4 }
 0x383   : >> { %vm394_vm12 = vcmp.lt.s32.totalorder %v392_v52, %v393_v53 }
 0x384   : >> { %v395_v54 = vsel %vm394_vm12, %v392_v52, %v393_v53 }
 0x385   : >> { %v396_v55 = vrot.slane %v395_v54, 2 }
 0x387   : >> { %vm397_vm13 = vcmp.lt.s32.totalorder %v395_v54, %v396_v55 }
 0x388   : >> { %v398_v56 = vsel %vm397_vm13, %v395_v54, %v396_v55 }
 0x389   : >> { %v399_v57 = vrot.slane %v398_v56, 1 }
 0x38b   : >> { %vm400_vm14 = vcmp.lt.s32.totalorder %v398_v56, %v399_v57 }
 0x38c   : >> { %v401_v58 = vsel %vm400_vm14, %v398_v56, %v399_v57 }
 0x38d   : >> { %677 = vpush %v401_v58 }
 0x3be   : >> { %s678_s26 = spop %677 }
 0x3bf   : >> { %v406_v59 = vstv %s678_s26  ;;  %s767_s26 = sshll.u32 (%p327_p11), %s892_s19, 4  ;;  %s768_s26 = int_to_ptr.vmem [resolvable:$false] %s767_s26 }
 0x3c0   : >> { %v407_v60 = vsel %vm1034_vm2, %v406_v59, %v877_v5   ;;  %vm413_vm15 = vcmp.eq.s32.totalorder %v985_v1, %v406_v59  ;;  %p770_p1 = scmp.lt.s32.totalorder (%p327_p11), %s487_s13, %s768_s26 }
 0x3c1   : >> { %v414_v61 = vsel %vm413_vm15, -1e+30, %v374_v38  ;;  %438 = vst.msk [vmem:[%s290_s16] sm:$0x1] (%p327_p11), %vm377_vm9, %v407_v60 }
 0x3c2   : >> { %v418_v62 = vsel %vm377_vm9, %v414_v61, -inf  ;;  %415 = vst.msk [vmem:[%s373_s18] sm:$0x1] %vm377_vm9, %v414_v61  ;;  %s763_s18 = scalar_lea.vmem (%p327_p11), %s487_s13, 16 }
 0x3c3   : >> { %419 = vmax.xlane.f32.xlu1 %v418_v62  ;;  %p764_p12 = scmp.ne.s32.totalorder (%p327_p11), %s487_s13, %s763_s18 }
 0x3c5   : > { %p765_p13 = pnand (%p327_p11), %p764_p12, %p968_p5 }
 0x3c7   : > { %p766_p0 = pneg (%p327_p11), %p765_p13 }
 0x450   : >> { %v420_v63 = vpop.xlane.xlu1 %419 }
 0x451   : >> { %v421_v0 = vrot.slane %v420_v63, 4 }
 0x453   : >> { %v422_v3 = vmax.f32 %v420_v63, %v421_v0 }
 0x455   : >> { %v423_v4 = vrot.slane %v422_v3, 2 }
 0x457   : >> { %v424_v6 = vmax.f32 %v422_v3, %v423_v4 }
 0x459   : >> { %v425_v7 = vrot.slane %v424_v6, 1 }
 0x45b   : >> { %v426_v8 = vmax.f32 %v424_v6, %v425_v7  ;;  %v1182_v6 = vmov %v1180_v18 }
 0x45d   : >> { %679 = vpush %v426_v8 }
 0x48a   : > { %329 = sbr.rel (!%p327_p11) target bundleno = 32 (0x20), region = 119 }
 0x48e   : >> { %s680_s28 = spop %679 }
 0x48f   : >> { %v428_v5 = vstv %s680_s28  ;;  %s769_s28 = scalar_lea.vmem (%p327_p11), %s768_s26, 32 }
 0x490   : >> { %v429_v2 = vsel %vm417_vm0, %v428_v5, %v885_v2   ;;  %v1181_v5 = vmov %v407_v60  ;;  %p771_p2 = scmp.lt.s32.totalorder (%p327_p11), %s769_s28, %s763_s18 }
 0x491   : > { %v665_v2 = vmul.f32 -1.442695, %v1180_v18 }
 0x492   : > { %p772_p3 = por %p771_p2, %p770_p1 }
 0x493   : > { %759 = vpow2.f32 %v665_v2 }
 0x494   : > { %p773_p4 = pnand %p772_p3, %p766_p0 }
 0x49d   : > { %v760_v12 = vpop.eup %759 }
 0x49e   : > { %v433_v1 = vadd.f32 1.0, %v760_v12 }
 0x4a0   : > { %761 = vrcp.f32 %v433_v1 }
 0x4aa   : > { %v762_v13 = vpop.eup %761 }
 0x4ab   : > { %437 = vst.msk [vmem:[%s284_s15] sm:$0x1] %vm377_vm9, %v762_v13 }
 0x4ac   : > { %776 = shalt.err (!%p773_p4)
}
 0x4ad   : > { %s777_s15 = scalar_lea.hbm %s1094_s14, 16  ;;  %s781_s30 = scalar_lea.hbm %s1170_s4, 32 }
 0x4ae   : > { %p778_p7 = scmp.ne.s32.totalorder %s1094_s14, %s777_s15  ;;  %p782_p10 = scmp.lt.u32.totalorder %s1094_s14, %s1170_s4 }
 0x4af   : > { %p783_p11 = scmp.lt.u32.totalorder %s781_s30, %s777_s15  ;;  %p785_p13 = scmp.lt.u32.totalorder %s777_s15, %s1094_s14 }
 0x4b0   : > { %p779_p8 = pnand %p778_p7, %p968_p5 }
 0x4b1   : > { %p784_p12 = por %p783_p11, %p782_p10 }
 0x4b2   : > { %p780_p9 = pneg %p779_p8 }
 0x4b3   : > { %p786_p0 = por %p785_p13, %p784_p12 }
 0x4b5   : > { %p787_p1 = pnand %p786_p0, %p780_p9 }
 0x4b7   : > { %790 = shalt.err (!%p787_p1)
}
 0x4b8   : > { %681 = dma.vmem_to_hbm [thread:$0]  (%p968_p5), %s487_s13, 16, %s1094_s14, %s466_s17  }
 0x4b9   : > { %s1119_s12 = scalar_lea.hbm %s1171_s5, %s667_s20  ;;  %s499_s11 = sshll.u32 %s290_s16, 4  ;;  %s500_s11 = int_to_ptr.vmem [resolvable:$true] %s499_s11 }
 0x4ba   : > { %s470_s15 = scalar_lea.sflag [#allocation7], %s979_s9  ;;  %s791_s30 = scalar_lea.vmem %s500_s11, 16 }
 0x4bb   : > { %p792_p2 = scmp.ne.s32.totalorder %s500_s11, %s791_s30  ;;  %s893_s19 = smov [#allocation6]  }
 0x4bc   : > { %s795_s26 = sshll.u32 %s893_s19, 4  ;;  %s796_s26 = int_to_ptr.vmem [resolvable:$false] %s795_s26 }
 0x4bd   : > { %p793_p3 = pnand %p792_p2, %p968_p5  ;;  %s797_s29 = scalar_lea.vmem %s796_s26, 32 }
 0x4be   : > { %p798_p7 = scmp.lt.s32.totalorder %s500_s11, %s796_s26  ;;  %p799_p8 = scmp.lt.s32.totalorder %s797_s29, %s791_s30 }
 0x4bf   : > { %p794_p4 = pneg %p793_p3 }
 0x4c0   : > { %p800_p9 = por %p799_p8, %p798_p7 }
 0x4c2   : > { %p801_p10 = pnand %p800_p9, %p794_p4 }
 0x4c4   : > { %804 = shalt.err (!%p801_p10)
}
 0x4c5   : > { %s805_s25 = scalar_lea.hbm %s1119_s12, 16  ;;  %s809_s20 = scalar_lea.hbm %s1171_s5, 32 }
 0x4c6   : > { %p806_p11 = scmp.ne.s32.totalorder %s1119_s12, %s805_s25  ;;  %p810_p0 = scmp.lt.u32.totalorder %s1119_s12, %s1171_s5 }
 0x4c7   : > { %p811_p1 = scmp.lt.u32.totalorder %s809_s20, %s805_s25  ;;  %p813_p3 = scmp.lt.u32.totalorder %s805_s25, %s1119_s12 }
 0x4c8   : > { %p807_p12 = pnand %p806_p11, %p968_p5 }
 0x4c9   : > { %p812_p2 = por %p811_p1, %p810_p0 }
 0x4ca   : > { %p808_p13 = pneg %p807_p12 }
 0x4cb   : > { %p814_p4 = por %p813_p3, %p812_p2 }
 0x4cd   : > { %p815_p7 = pnand %p814_p4, %p808_p13 }
 0x4cf   : > { %818 = shalt.err (!%p815_p7)
}
 0x4d0   : > { %682 = dma.vmem_to_hbm [thread:$0]  (%p968_p5), %s500_s11, 16, %s1119_s12, %s470_s15   ;;  %v443_v14 = vpop.permute.xlu0 %442  ;;  %vm451_vm1 = vcmask 15360   ;;  %vm453_vm2 = vcmask 23552   ;;  %vm463_vm3 = vcmask 31744  }
 0x4d1   : > { %v446_v15 = vadd.f32 %v443_v14, %v1076_v10  ;;  %s894_s29 = smov 2   ;;  %v445_v16 = vsub.f32 %v1076_v10, %v443_v14  ;;  %s1183_s28 = scalar_lea.vmem %s1169_s3, %s983_s10 }
 0x4d2   : > { %v666_v17 = vld [vmem:[%s1183_s28] ss:$0 sm:$0xff] }
 0x4d3   : > { %448 = vrot.lane.b32.xlu0 %v446_v15, %s894_s29 }
 0x545   : > { %v449_v18 = vpop.permute.xlu0 %448 }
 0x546   : > { %v452_v19 = vsel %vm451_vm1, %v445_v16, %v449_v18 }
 0x547   : > { %v454_v20 = vsel %vm453_vm2, %v452_v19, %v449_v18 }
 0x548   : > { %v462_v21 = vmul.f32 %v666_v17, %v454_v20 }
 0x54a   : > { %464 = vst.msk [vmem:[%s1008_s2] sm:$0xff] %vm463_vm3, %v462_v21 }
 0x54b PF: > { %p692_p5 = scmp.ge.s32.totalorder %s873_s24, 2  ;;  %s514_s7 = sand.u32 1, %s861_s21  }
 0x54c   : > { %s515_s12 = scalar_lea.sflag [#allocation5], %s514_s7 }
 0x54d   : > { %p686_p8 = pnand %p692_p5, %p972_p6 }
 0x54f   : > { %852 = dma.done.wait (!%p686_p8), %s515_s12, 16  }
 0x550   : > { %854 = vsyncadd (!%p686_p8), %s515_s12, 4294967280  ;;  %s523_s11 = scalar_lea.sflag [#allocation7], %s514_s7 }
 0x551   : > { %856 = dma.done.wait (!%p686_p8), %s523_s11, 16  }
 0x552   : > { %858 = vsyncadd (!%p686_p8), %s523_s11, 4294967280  ;;  %s1184_s10 = sld [smem:[#allocation10_spill]]  ;;  %p20_p9 = scmp.ge.s32.totalorder %s955_s27, 4  }
 0x553   : > { %s1185_s21 = smov %s865_s22  ;;  %s1186_s22 = smov %s869_s23 }
 0x554   : > { %s1188_s24 = smov %s955_s27  ;;  %22 = sbr.rel (!%p20_p9) target bundleno = 7 (0x7), region = 130 }
 0x558   : > { %s1187_s23 = smov %s1184_s10 }
 0x55b   :  { %534 = vsyncpa [#allocation5], 1 }
 0x55c   :  { %536 = vsyncpa [#allocation5 + $0x1], 1 }
 0x55d   :  { %537 = vsyncpa [#allocation7], 1 }
 0x55e   :  { %539 = vsyncpa [#allocation7 + $0x1], 1 }

</bundles_post_ra>
